<compile_context>
chip_gen: v7x
topology: tpu7x:2x2x1
jax: 0.10.0
libtpu: 0.0.40
codegen_flags: <defaults>
</compile_context>

<pallas_src>
import functools

import jax
import jax.numpy as jnp
from jax import lax
from jax.experimental import pallas as pl
from jax.experimental.pallas import tpu as pltpu


_TARGET_BLOCK_BYTES = 4 * 1024 * 1024   # ~4 MiB of input per grid step
_VMEM_BUDGET_BYTES = 40 * 1024 * 1024   # fit check: I/O double-buffer + f32 temps
_VMEM_LIMIT_BYTES = 48 * 1024 * 1024    # > v5e 16 MiB scoped default, < v7x 64 MiB
_F32_TEMPS = 4                          # ~live f32 block-sized temporaries in-kernel


def _kernel_bytes(rows, cols, in_item, out_item):
    """Approx VMEM per grid step: double-buffered in+out + f32 temporaries."""
    return rows * cols * (2 * in_item + 2 * out_item + _F32_TEMPS * 4)


# ---------------------------------------------------------------------------
# Path A: flat, lane-dense layout  (N, L = H*W), whole planes per block.
# ---------------------------------------------------------------------------
def _gradient_flat_kernel(x_ref, o_ref, *, W):
    x = x_ref[...].astype(jnp.float32)                   # (TN, L)
    L = x.shape[-1]
    idx = lax.broadcasted_iota(jnp.int32, (1, L), 1)     # flat index in a plane

    # Right neighbour x[., j+1]: circular shift by -1 == L-1; mask last column.
    x_right = pltpu.roll(x, shift=L - 1, axis=1)
    if (W & (W - 1)) == 0:                                # power of two: bit mask
        col = jnp.bitwise_and(idx, W - 1)
    else:
        col = idx % W
    gx = jnp.where(col != W - 1, x - x_right, 0.0)
    acc = gx * gx                                         # x_right dead from here

    # Down neighbour x[., j+W]: circular shift by -W == L-W; mask last row.
    x_down = pltpu.roll(x, shift=L - W, axis=1)
    gy = jnp.where(idx < L - W, x - x_down, 0.0)
    acc = acc + gy * gy

    o_ref[...] = jnp.sqrt(acc).astype(o_ref.dtype)


# ---------------------------------------------------------------------------
# Path B: big planes — per-plane kernel tiled along H with a one-row halo.
# ---------------------------------------------------------------------------
def _gradient_plane_kernel(*refs, W, H, TH, chunked):
    if chunked:
        x_ref, halo_ref, o_ref = refs
    else:
        x_ref, o_ref = refs
        halo_ref = None
    h = pl.program_id(1)
    x = x_ref[...].astype(jnp.float32)                    # (1, TH, W)

    # Right neighbour (within a row, fully inside the block).
    x_right = pltpu.roll(x, shift=W - 1, axis=2)
    col = lax.broadcasted_iota(jnp.int32, (1, 1, W), 2)
    gx = jnp.where(col < W - 1, x - x_right, 0.0)
    acc = gx * gx

    # Down neighbour: roll within the H-chunk; the chunk's last row takes the
    # first row of the next chunk (halo).  The plane's true last row is masked.
    x_down = pltpu.roll(x, shift=TH - 1, axis=1)
    row = lax.broadcasted_iota(jnp.int32, (1, TH, 1), 1)
    if chunked:
        halo0 = halo_ref[:, 0:1, :].astype(jnp.float32)   # (1, 1, W)
        x_down = jnp.where(row == TH - 1, halo0, x_down)
    gy = jnp.where(row + h * TH < H - 1, x - x_down, 0.0)
    acc = acc + gy * gy

    o_ref[...] = jnp.sqrt(acc).astype(o_ref.dtype)


def gradient(img: jax.Array, *,
             target_block_bytes: int = _TARGET_BLOCK_BYTES,
             vmem_budget_bytes: int = _VMEM_BUDGET_BYTES) -> jax.Array:
    """img: (B, C, H, W) (NCHW). Returns (B, C, H, W) gradient magnitude."""
    B = img.shape[0]
    H, W = int(img.shape[-2]), int(img.shape[-1])
    L = H * W

    out_dtype = img.dtype if jnp.issubdtype(img.dtype, jnp.floating) else jnp.float32
    in_item = jnp.dtype(img.dtype).itemsize
    out_item = jnp.dtype(out_dtype).itemsize

    x3 = img.reshape(-1, H, W)
    N = x3.shape[0]

    plane_cost = _kernel_bytes(1, L, in_item, out_item)
    min_tn = N if N < 8 else 8            # smallest sublane-legal flat block
    use_flat = min_tn * plane_cost <= vmem_budget_bytes

    if use_flat:
        # ---------------- flat, lane-dense path ----------------
        x = x3.reshape(N, L)
        bytes_per_plane = L * in_item
        tn = max(1, target_block_bytes // bytes_per_plane)
        tn = min(tn, N)
        # Keep >= ~8 grid steps when N allows so both v7x TensorCores get
        # several steps each and the double-buffer overlaps DMA with compute.
        if N >= 64:
            tn = min(tn, N // 8)
        elif N >= 16:
            tn = min(tn, N // 2)
        # Sublane-dense blocks: a multiple of 8 planes, or all of N.
        if tn < N:
            tn = max(8, (tn // 8) * 8)
            if tn > N:
                tn = N
        # Shrink until the VMEM budget fits (I/O double-buffer + f32 temps).
        while tn > min_tn and _kernel_bytes(tn, L, in_item, out_item) > vmem_budget_bytes:
            tn = max(min_tn, tn - 8)
        grid_n = pl.cdiv(N, tn)           # partial last block is handled by Pallas

        out = pl.pallas_call(
            functools.partial(_gradient_flat_kernel, W=W),
            out_shape=jax.ShapeDtypeStruct((N, L), out_dtype),
            grid_spec=pltpu.PrefetchScalarGridSpec(
                num_scalar_prefetch=0,
                grid=(grid_n,),
                in_specs=[pl.BlockSpec((tn, L), lambda n: (n, 0))],
                out_specs=pl.BlockSpec((tn, L), lambda n: (n, 0)),
            ),
            compiler_params=pltpu.CompilerParams(
                dimension_semantics=("parallel",),
                vmem_limit_bytes=_VMEM_LIMIT_BYTES),
        )(x)
        return out.reshape(B, -1, H, W)

    # ---------------- big-plane path: tile along H with one-row halo --------
    # NOTE: for huge planes with W < 128 this path is lane-sparse; such shapes
    # are not expected for images.
    per_row = _kernel_bytes(1, W, in_item, out_item)
    th = max(1, min(target_block_bytes // max(1, W * in_item),
                    vmem_budget_bytes // max(1, per_row)))
    th = min(th, H)
    if th < H:
        th = max(8, (th // 8) * 8)        # sublane-dense chunks
        th = min(th, H)
    chunked = th < H                      # chunked => th % 8 == 0
    grid_h = pl.cdiv(H, th)

    in_specs = [pl.BlockSpec((1, th, W), lambda n, h: (n, h, 0))]
    operands = [x3]
    if chunked:
        halo_step = th // 8
        max_halo_idx = pl.cdiv(H, 8) - 1  # clamp at the bottom edge (row masked)
        in_specs.append(pl.BlockSpec(
            (1, 8, W),
            lambda n, h: (n, jnp.minimum((h + 1) * halo_step, max_halo_idx), 0)))
        operands.append(x3)

    out = pl.pallas_call(
        functools.partial(_gradient_plane_kernel, W=W, H=H, TH=th, chunked=chunked),
        out_shape=jax.ShapeDtypeStruct((N, H, W), out_dtype),
        grid_spec=pltpu.PrefetchScalarGridSpec(
            num_scalar_prefetch=0,
            grid=(N, grid_h),
            in_specs=in_specs,
            out_specs=pl.BlockSpec((1, th, W), lambda n, h: (n, h, 0)),
        ),
        compiler_params=pltpu.CompilerParams(
            dimension_semantics=("parallel", "parallel"),
            vmem_limit_bytes=_VMEM_LIMIT_BYTES),
    )(*operands)
    return out.reshape(B, -1, H, W)


def _reference(img: jnp.ndarray) -> jnp.ndarray:
    """Pure-JAX reference matching the PyTorch module exactly."""
    B = img.shape[0]
    H, W = img.shape[-2], img.shape[-1]
    x = img.reshape(-1, H, W).astype(jnp.float32)
    gx = jnp.pad(x[:, :, :-1] - x[:, :, 1:], ((0, 0), (0, 0), (0, 1)))
    gy = jnp.pad(x[:, :-1, :] - x[:, 1:, :], ((0, 0), (0, 1), (0, 0)))
    return jnp.sqrt(gx ** 2 + gy ** 2).reshape(B, -1, H, W)


if __name__ == "__main__":
    # Primary check: shapes implied by the module spec (B=2, C=4, 16x16).
    img = jax.random.normal(jax.random.PRNGKey(0), (2, 4, 16, 16), dtype=jnp.float32)
    out = gradient(img)
    jax.block_until_ready(out)
    assert out.shape == (2, 4, 16, 16), out.shape
    assert out.dtype == img.dtype
    ref = _reference(img)
    assert jnp.allclose(out, ref, atol=1e-5, rtol=1e-5), \
        float(jnp.max(jnp.abs(out - ref)))

    # Multi-step flat path (several grid steps + partial last block): N = 20.
    img2 = jax.random.normal(jax.random.PRNGKey(1), (2, 10, 16, 16), dtype=jnp.float32)
    out2 = gradient(img2, target_block_bytes=2048)
    assert jnp.allclose(out2, _reference(img2), atol=1e-5, rtol=1e-5), \
        float(jnp.max(jnp.abs(out2 - _reference(img2))))

    # Big-plane path (H-chunked, one-row halo, clamped halo + partial chunk),
    # forced at test-friendly shapes via a tiny VMEM budget.
    img3 = jax.random.normal(jax.random.PRNGKey(2), (1, 2, 40, 128), dtype=jnp.float32)
    out3 = gradient(img3, target_block_bytes=8 * 1024, vmem_budget_bytes=64 * 1024)
    assert jnp.allclose(out3, _reference(img3), atol=1e-5, rtol=1e-5), \
        float(jnp.max(jnp.abs(out3 - _reference(img3))))

    print("KERNEL_OK")
</pallas_src>

<mosaic_0001>
module attributes {stable_mosaic.version = 11 : i64} {
  func.func @_gradient_flat_kernel(%arg0: i32, %arg1: memref<8x256xf32, #tpu.memory_space<vmem>>, %arg2: memref<8x256xf32, #tpu.memory_space<vmem>>) attributes {dimension_semantics = [#tpu.dimension_semantics<parallel>], iteration_bounds = array<i64: 1>, scalar_prefetch = 0 : i64, scratch_operands = 0 : i64, tpu.core_type = #tpu.core_type<tc>, window_params = [{transform_indices = @transform_0, window_bounds = array<i64: 8, 256>}, {transform_indices = @transform_1, window_bounds = array<i64: 8, 256>}]} {
    %c0 = arith.constant 0 : index
    %c0_0 = arith.constant 0 : index
    %0 = vector.load %arg1[%c0, %c0_0] : memref<8x256xf32, #tpu.memory_space<vmem>>, vector<8x256xf32>
    %1 = tpu.iota {dimensions = array<i32: 1>} : vector<1x256xi32>
    %c255_i32 = arith.constant 255 : i32
    %2 = tpu.dynamic_rotate %0 by %c255_i32 dim 1 : vector<8x256xf32>, i32 -> vector<8x256xf32>
    %c15_i32 = arith.constant 15 : i32
    %3 = vector.broadcast %c15_i32 : i32 to vector<1x256xi32>
    %4 = arith.andi %1, %3 : vector<1x256xi32>
    %c15_i32_1 = arith.constant 15 : i32
    %5 = vector.broadcast %c15_i32_1 : i32 to vector<1x256xi32>
    %6 = arith.cmpi ne, %4, %5 : vector<1x256xi32>
    %7 = arith.subf %0, %2 : vector<8x256xf32>
    %cst = arith.constant 0.000000e+00 : f32
    %8 = vector.shape_cast %6 : vector<1x256xi1> to vector<1x256xi1>
    %9 = vector.broadcast %8 : vector<1x256xi1> to vector<8x256xi1>
    %10 = vector.broadcast %cst : f32 to vector<8x256xf32>
    %11 = arith.select %9, %7, %10 : vector<8x256xi1>, vector<8x256xf32>
    %12 = arith.mulf %11, %11 : vector<8x256xf32>
    %c240_i32 = arith.constant 240 : i32
    %13 = tpu.dynamic_rotate %0 by %c240_i32 dim 1 : vector<8x256xf32>, i32 -> vector<8x256xf32>
    %c240_i32_2 = arith.constant 240 : i32
    %14 = vector.broadcast %c240_i32_2 : i32 to vector<1x256xi32>
    %15 = arith.cmpi slt, %1, %14 : vector<1x256xi32>
    %16 = arith.subf %0, %13 : vector<8x256xf32>
    %cst_3 = arith.constant 0.000000e+00 : f32
    %17 = vector.shape_cast %15 : vector<1x256xi1> to vector<1x256xi1>
    %18 = vector.broadcast %17 : vector<1x256xi1> to vector<8x256xi1>
    %19 = vector.broadcast %cst_3 : f32 to vector<8x256xf32>
    %20 = arith.select %18, %16, %19 : vector<8x256xi1>, vector<8x256xf32>
    %21 = arith.mulf %20, %20 : vector<8x256xf32>
    %22 = arith.addf %12, %21 : vector<8x256xf32>
    %23 = math.sqrt %22 : vector<8x256xf32>
    %c0_4 = arith.constant 0 : index
    %c0_5 = arith.constant 0 : index
    %24 = vector.load %arg2[%c0_4, %c0_5] : memref<8x256xf32, #tpu.memory_space<vmem>>, vector<8x256xf32>
    tpu.vector_store %arg2[%c0_4, %c0_5], %23 {strides = array<i32>} : memref<8x256xf32, #tpu.memory_space<vmem>>, vector<8x256xf32>,
    return
  }
  func.func @transform_0(%arg0: i32) -> (i32, i32) {
    %c0_i32 = arith.constant 0 : i32
    %c0_i32_0 = arith.constant 0 : i32
    return %arg0, %c0_i32 : i32, i32
  }
  func.func @transform_1(%arg0: i32) -> (i32, i32) {
    %c0_i32 = arith.constant 0 : i32
    %c0_i32_0 = arith.constant 0 : i32
    return %arg0, %c0_i32 : i32, i32
  }
}

</mosaic_0001>

<bundles_post_ra>
// kernel: tpu_custom_call.1
= control target key start
LH: loop header
LB: loop body
LE: loop exit
PB: predicated region body
PF: predicated region fallthrough
CT: control target
= control target key end

     0   :  { %6 = vsyncpa [#allocation3], 0  ;;  %s193_s0 = inlined_call_operand.hbm [shape: f32[8,256], index: 0, kind: input, shape index: {}]   ;;  %s194_s1 = inlined_call_operand.hbm [shape: f32[8,256], index: 1, kind: output, shape index: {}]  }
   0x1   :  { %7 = vsyncpa [#allocation4], 0  ;;  %s155_s6 = smov [#allocation2]   ;;  %s107_s10 = scalar_lea.hbm %s193_s0, 256 }
   0x2   :  { %s14_s7 = sshll.u32 %s155_s6, 4  ;;  %p108_p0 = scmp.ne.s32.totalorder %s193_s0, %s107_s10  ;;  %s15_s7 = int_to_ptr.vmem [resolvable:$true] %s14_s7 }
   0x3   :  { %p111_p1 = scmp.lt.u32.totalorder %s107_s10, %s193_s0 }
   0x5   :  { %p113_p2 = pnand %p111_p1, %p108_p0 }
   0x7   :  { %116 = shalt.err (!%p113_p2)
}
   0x8   :  { %s117_s15 = scalar_lea.vmem %s15_s7, 256  ;;  %p122_p4 = scmp.lt.s32.totalorder %s15_s7, %s15_s7 }
   0x9   :  { %p118_p3 = scmp.ne.s32.totalorder %s15_s7, %s117_s15  ;;  %p123_p5 = scmp.lt.s32.totalorder %s117_s15, %s117_s15 }
   0xb   :  { %p124_p6 = por %p123_p5, %p122_p4 }
   0xd   :  { %p125_p7 = pnand %p124_p6, %p118_p3 }
   0xf   :  { %128 = shalt.err (!%p125_p7)
}
  0x10   :  { %17 = dma.hbm_to_vmem [thread:$0]  %s193_s0, 256, %s15_s7, [#allocation3]  }
  0x11   :  { %151 = dma.done.wait [#allocation3], 256  }
  0x12   :  { %152 = vsyncadd [#allocation3], 4294967040  ;;  %v21_v0 = vld [vmem:[#allocation2] sm:$0xff]  ;;  %s156_s18 = smov 112   ;;  %s157_s19 = smov 127   ;;  %v22_v1 = vld [vmem:[#allocation2 + $0x8] sm:$0xff]  ;;  %v23_v2 = vlaneseq }
  0x13   :  { %47 = vrot.lane.b32.xlu1 %v21_v0, %s156_s18  ;;  %26 = vrot.lane.b32.xlu0 %v21_v0, %s157_s19  ;;  %s158_s0 = smov [#allocation5]  }
  0x14   :  { %v24_v3 = vand.u32 127, %v23_v2  ;;  %s90_s20 = sshll.u32 %s158_s0, 4  ;;  %s91_s20 = int_to_ptr.vmem [resolvable:$true] %s90_s20 }
  0x15   :  { %s129_s21 = scalar_lea.vmem %s91_s20, 256  ;;  %p134_p9 = scmp.lt.s32.totalorder %s91_s20, %s91_s20 }
  0x16   :  { %v25_v4 = vadd.s32 128, %v24_v3  ;;  %v33_v7 = vand.u32 15, %v24_v3  ;;  %vm51_vm0 = vcmp.lt.s32.totalorder %v24_v3, 112  ;;  %vm30_vm1 = vcmp.lt.s32.totalorder %v24_v3, 127  ;;  %p130_p8 = scmp.ne.s32.totalorder %s91_s20, %s129_s21  ;;  %p135_p10 = scmp.lt.s32.totalorder %s129_s21, %s129_s21 }
  0x17   :  { %49 = vrot.lane.b32.xlu1 %v22_v1, %s156_s18  ;;  %28 = vrot.lane.b32.xlu0 %v22_v1, %s157_s19 }
  0x18   :  { %v34_v8 = vand.u32 15, %v25_v4  ;;  %vm55_vm2 = vcmp.lt.s32.totalorder %v25_v4, 240  ;;  %vm35_vm3 = vcmp.ne.s32.totalorder %v33_v7, 15  ;;  %p136_p11 = por %p135_p10, %p134_p9 }
  0x1a   :  { %vm36_vm4 = vcmp.ne.s32.totalorder %v34_v8, 15  ;;  %p137_p12 = pnand %p136_p11, %p130_p8 }
  0x85   :  { %v48_v5 = vpop.permute.xlu1 %47  ;;  %v27_v6 = vpop.permute.xlu0 %26 }
  0x89   :  { %v50_v9 = vpop.permute.xlu1 %49  ;;  %v29_v10 = vpop.permute.xlu0 %28 }
  0x8a   :  { %v52_v11 = vsel %vm51_vm0, %v48_v5, %v50_v9  ;;  %v53_v12 = vsel %vm51_vm0, %v50_v9, %v48_v5  ;;  %v31_v13 = vsel %vm30_vm1, %v27_v6, %v29_v10  ;;  %v32_v14 = vsel %vm30_vm1, %v29_v10, %v27_v6 }
  0x8b   :  { %v56_v15 = vsub.f32 %v21_v0, %v52_v11  ;;  %v57_v16 = vsub.f32 %v22_v1, %v53_v12  ;;  %v37_v17 = vsub.f32 %v21_v0, %v31_v13  ;;  %v38_v18 = vsub.f32 %v22_v1, %v32_v14 }
  0x8d   :  { %v63_v19 = vsel %vm55_vm2, %v57_v16, 0.0  ;;  %v64_v20 = vmul.f32 %v56_v15, %v56_v15  ;;  %v43_v21 = vsel %vm35_vm3, %v37_v17, 0.0  ;;  %v44_v22 = vsel %vm36_vm4, %v38_v18, 0.0 }
  0x8e   :  { %v65_v23 = vmul.f32 %v63_v19, %v63_v19  ;;  %v45_v24 = vmul.f32 %v43_v21, %v43_v21  ;;  %v46_v25 = vmul.f32 %v44_v22, %v44_v22 }
  0x90   :  { %v66_v26 = vadd.f32 %v64_v20, %v45_v24  ;;  %v67_v27 = vadd.f32 %v65_v23, %v46_v25 }
  0x92   :  { %103 = vrsqrt.f32 %v66_v26  ;;  %vm70_vm5 = vcmp.eq.f32.partialorder %v66_v26, inf  ;;  %v73_v31 = vand.u32 2147483648, %v66_v26  ;;  %vm72_vm6 = vcmp.eq.f32.partialorder %v66_v26, 0.0 }
  0x93   :  { %105 = vrsqrt.f32 %v67_v27  ;;  %vm77_vm7 = vcmp.eq.f32.partialorder %v67_v27, inf  ;;  %v80_v34 = vand.u32 2147483648, %v67_v27  ;;  %vm79_vm8 = vcmp.eq.f32.partialorder %v67_v27, 0.0 }
  0x9c   :  { %v104_v28 = vpop.eup %103 }
  0x9d   :  { %v106_v29 = vpop.eup %105  ;;  %v69_v30 = vmul.f32 %v104_v28, %v66_v26 }
  0x9e   :  { %v76_v32 = vmul.f32 %v106_v29, %v67_v27 }
  0x9f   :  { %v71_v33 = vsel %vm70_vm5, %v66_v26, %v69_v30 }
  0xa0   :  { %v74_v35 = vsel %vm72_vm6, %v73_v31, %v71_v33  ;;  %v78_v36 = vsel %vm77_vm7, %v67_v27, %v76_v32 }
  0xa1   :  { %v81_v37 = vsel %vm79_vm8, %v80_v34, %v78_v36  ;;  %82 = vst [vmem:[#allocation5] sm:$0xff] %v74_v35 }
  0xa2   :  { %83 = vst [vmem:[#allocation5 + $0x8] sm:$0xff] %v81_v37 }
  0xa3   :  { %140 = shalt.err (!%p137_p12)
}
  0xa4   :  { %s141_s24 = scalar_lea.hbm %s194_s1, 256 }
  0xa5   :  { %p142_p13 = scmp.ne.s32.totalorder %s194_s1, %s141_s24  ;;  %p145_p0 = scmp.lt.u32.totalorder %s141_s24, %s194_s1 }
  0xa7   :  { %p147_p1 = pnand %p145_p0, %p142_p13 }
  0xa9   :  { %150 = shalt.err (!%p147_p1)
}
  0xaa   :  { %93 = dma.vmem_to_hbm [thread:$0]  %s91_s20, 256, %s194_s1, [#allocation4]  }
  0xab   :  { %153 = dma.done.wait [#allocation4], 256  }
  0xac   :  { %154 = vsyncadd [#allocation4], 4294967040 }
  0xad   :  { %97 = vsyncpa [#allocation3], 1 }
  0xae   :  { %98 = vsyncpa [#allocation4], 1 }

</bundles_post_ra>
